<compile_context>
chip_gen: v6e
topology: v6e:2x2x1
jax: 0.10.0
libtpu: 0.0.40
codegen_flags: <defaults>
</compile_context>

<pallas_src>
import functools

import jax
import jax.numpy as jnp
from jax.experimental import pallas as pl
from jax.experimental.pallas import tpu as pltpu


def _round_up(x, m):
    return (x + m - 1) // m * m


def _choose_tll(l_out, c_in, c_out, k, stride, in_itemsize):
    """Lane tile (# output positions per grid step): multiple of 128, <=1024,
    >=2 L-tiles when L_out allows, shrunk to respect v7x's scoped-VMEM default."""
    tll = min(1024, _round_up(l_out, 128))
    if l_out > 128:                      # >=2 L-tiles -> pipelining / sharding
        tll = min(tll, _round_up(pl.cdiv(l_out, 2), 128))

    def vmem_bytes(t):
        ts = t * stride
        dbuf = 2 * (c_in * (ts + 128) + c_out * t) * in_itemsize      # x main+halo, out
        resid = 2 * (k * c_out * c_in * in_itemsize + c_out * 4)      # weight + f32 bias
        work = (c_in * (ts + 128) + c_out * t) * 4                    # concat copy + f32 acc
        return dbuf + resid + work

    while tll > 128 and vmem_bytes(tll) > 20 * 1024 * 1024:
        tll = max(128, _round_up(tll // 2, 128))
    return tll


def _conv1d_relu_kernel(x_main_ref, x_halo_ref, w_ref, b_ref, o_ref, *, stride):
    # x_main_ref : (1, C_in, TLL*stride)  input columns owned by this tile
    # x_halo_ref : (1, C_in, 128)         next 128 columns (receptive-field halo)
    # w_ref      : (K, C_out, C_in)       resident tap-major weight
    # b_ref      : (C_out, 1)             resident f32 bias
    # o_ref      : (1, C_out, TLL)        lane-dense output tile
    k_taps = w_ref.shape[0]
    c_out, tll = o_ref.shape[1], o_ref.shape[2]

    # All input columns this tile's receptive fields can touch: main + halo.
    x_all = jnp.concatenate([x_main_ref[0], x_halo_ref[0]], axis=-1)

    acc = jnp.zeros((c_out, tll), jnp.float32)
    for k in range(k_taps):              # K is small & static -> unrolled
        if stride == 1:
            tap = jax.lax.slice_in_dim(x_all, k, k + tll, axis=1)
        else:
            tap = jax.lax.slice(x_all, (0, k),
                                (x_all.shape[0], k + (tll - 1) * stride + 1),
                                (1, stride))
        acc = acc + jnp.dot(w_ref[k], tap,
                            preferred_element_type=jnp.float32,
                            precision=jax.lax.Precision.HIGHEST)

    acc = acc + b_ref[...]                                   # f32 epilogue
    o_ref[0] = jnp.maximum(acc, 0.0).astype(o_ref.dtype)     # ReLU


@functools.partial(jax.jit, static_argnames=("stride", "padding", "compute_dtype"))
def basic_conv1d(x_ncl, weight, bias, *, stride=1, padding=0, compute_dtype=None):
    """x_ncl: [B, C_in, L]; weight: [C_out, C_in, K]; bias: [C_out].

    Returns [B, C_out, L_out] matching nn.Conv1d(stride, padding) + ReLU.
    """
    B, C_in, L = x_ncl.shape
    C_out, C_in_w, K = weight.shape
    assert C_in == C_in_w

    L_in = L + 2 * padding
    L_out = (L_in - K) // stride + 1
    assert L_out >= 1

    in_dtype = jnp.dtype(x_ncl.dtype)
    cdt = jnp.dtype(compute_dtype) if compute_dtype is not None else in_dtype

    TLL = _choose_tll(L_out, C_in, C_out, K, stride, cdt.itemsize)
    NLT = pl.cdiv(L_out, TLL)
    TLLS = TLL * stride                  # input columns consumed per tile
    HB = TLLS // 128                     # halo block-index step (TLL % 128 == 0)

    # One fused pad: conv padding (left) plus right-padding so every main/halo
    # block is fully in-bounds.  Padded columns only ever feed output positions
    # >= L_out, which are sliced off below.
    L_x = max(NLT * TLLS + 128, L_in)
    x_pad = jnp.pad(x_ncl, ((0, 0), (0, 0), (padding, L_x - L - padding)))
    if cdt != in_dtype:
        x_pad = x_pad.astype(cdt)

    # weight [C_out, C_in, K] -> tap-major [K, C_out, C_in] (tiny, resident).
    w_t = jnp.transpose(weight, (2, 0, 1)).astype(cdt)
    b_2d = bias.astype(jnp.float32).reshape(C_out, 1)

    L_out_p = NLT * TLL
    cost = pl.CostEstimate(
        flops=2 * B * L_out * K * C_in * C_out,
        transcendentals=0,
        bytes_accessed=(B * C_in * L_x + K * C_out * C_in) * cdt.itemsize
        + C_out * 4
        + B * C_out * L_out_p * in_dtype.itemsize,
    )

    out_p = pl.pallas_call(
        functools.partial(_conv1d_relu_kernel, stride=stride),
        out_shape=jax.ShapeDtypeStruct((B, C_out, L_out_p), in_dtype),
        grid_spec=pltpu.PrefetchScalarGridSpec(
            num_scalar_prefetch=0,
            grid=(B, NLT),
            in_specs=[
                pl.BlockSpec((1, C_in, TLLS), lambda b, m: (b, 0, m)),             # x (main)
                pl.BlockSpec((1, C_in, 128), lambda b, m: (b, 0, (m + 1) * HB)),   # x (halo)
                pl.BlockSpec((K, C_out, C_in), lambda b, m: (0, 0, 0)),            # weight
                pl.BlockSpec((C_out, 1), lambda b, m: (0, 0)),                     # bias
            ],
            out_specs=pl.BlockSpec((1, C_out, TLL), lambda b, m: (b, 0, m)),
        ),
        compiler_params=pltpu.CompilerParams(
            # v7x: use (pltpu.CORE_PARALLEL, pltpu.PARALLEL) to shard across TCs.
            dimension_semantics=("parallel", "parallel"),
        ),
        cost_estimate=cost,
    )(x_pad, x_pad, w_t, b_2d)

    # Layout is already NCL; only strip the L_out tiling pad.
    return out_p[:, :, :L_out]


def _reference(x_ncl, weight, bias, *, stride=1, padding=0):
    y = jax.lax.conv_general_dilated(
        x_ncl, weight,
        window_strides=(stride,),
        padding=[(padding, padding)],
        dimension_numbers=("NCH", "OIH", "NCH"),
        precision=jax.lax.Precision.HIGHEST,
    )
    y = y + bias[None, :, None]
    return jnp.maximum(y, 0.0)


if __name__ == "__main__":
    # BasicConv1d(in_channels=4, out_channels=8, kernel_size=3) on x [2, 4, 16].
    B, C_in, C_out, L, K = 2, 4, 8, 16, 3

    key = jax.random.PRNGKey(0)
    kx, kw, kb = jax.random.split(key, 3)

    x = jax.random.normal(kx, (B, C_in, L), dtype=jnp.float32)
    fan_in = C_in * K
    bound = 1.0 / (fan_in ** 0.5)
    weight = jax.random.uniform(kw, (C_out, C_in, K), jnp.float32,
                                minval=-bound, maxval=bound)
    bias = jax.random.uniform(kb, (C_out,), jnp.float32,
                              minval=-bound, maxval=bound)

    out = jax.block_until_ready(basic_conv1d(x, weight, bias))
    ref = jax.block_until_ready(_reference(x, weight, bias))

    assert out.shape == (B, C_out, L - K + 1), out.shape
    assert jnp.allclose(out, ref, atol=1e-5, rtol=1e-5), \
        float(jnp.max(jnp.abs(out - ref)))
    print("KERNEL_OK")
</pallas_src>

<mosaic_0001>
module attributes {stable_mosaic.version = 11 : i64} {
  func.func @_conv1d_relu_kernel(%arg0: i32, %arg1: i32, %arg2: memref<1x4x128xf32, #tpu.memory_space<vmem>>, %arg3: memref<1x4x128xf32, #tpu.memory_space<vmem>>, %arg4: memref<3x8x4xf32, #tpu.memory_space<vmem>>, %arg5: memref<8x1xf32, #tpu.memory_space<vmem>>, %arg6: memref<1x8x128xf32, #tpu.memory_space<vmem>>) attributes {dimension_semantics = [#tpu.dimension_semantics<parallel>, #tpu.dimension_semantics<parallel>], iteration_bounds = array<i64: 2, 1>, scalar_prefetch = 0 : i64, scratch_operands = 0 : i64, tpu.core_type = #tpu.core_type<tc>, window_params = [{transform_indices = @transform_0, window_bounds = array<i64: 1, 4, 128>}, {transform_indices = @transform_1, window_bounds = array<i64: 1, 4, 128>}, {pipeline_mode = #tpu.pipeline_mode<synchronous>, transform_indices = @transform_2, window_bounds = array<i64: 3, 8, 4>}, {pipeline_mode = #tpu.pipeline_mode<synchronous>, transform_indices = @transform_3, window_bounds = array<i64: 8, 1>}, {transform_indices = @transform_4, window_bounds = array<i64: 1, 8, 128>}]} {
    %c0 = arith.constant 0 : index
    %c0_0 = arith.constant 0 : index
    %c0_1 = arith.constant 0 : index
    %0 = vector.load %arg2[%c0, %c0_0, %c0_1] : memref<1x4x128xf32, #tpu.memory_space<vmem>>, vector<1x4x128xf32>
    %1 = vector.shape_cast %0 : vector<1x4x128xf32> to vector<4x128xf32>
    %c0_2 = arith.constant 0 : index
    %c0_3 = arith.constant 0 : index
    %c0_4 = arith.constant 0 : index
    %2 = vector.load %arg3[%c0_2, %c0_3, %c0_4] : memref<1x4x128xf32, #tpu.memory_space<vmem>>, vector<1x4x128xf32>
    %3 = vector.shape_cast %2 : vector<1x4x128xf32> to vector<4x128xf32>
    %4 = tpu.concatenate %1, %3 in 1 : vector<4x128xf32>, vector<4x128xf32> -> vector<4x256xf32>
    %cst = arith.constant 0.000000e+00 : f32
    %5 = vector.broadcast %cst : f32 to vector<8x128xf32>
    %6 = vector.extract_strided_slice %4 {offsets = [0, 0], sizes = [4, 128], strides = [1, 1]} : vector<4x256xf32> to vector<4x128xf32>
    %c0_5 = arith.constant 0 : index
    %c0_6 = arith.constant 0 : index
    %c0_7 = arith.constant 0 : index
    %7 = vector.load %arg4[%c0_5, %c0_6, %c0_7] : memref<3x8x4xf32, #tpu.memory_space<vmem>>, vector<1x8x4xf32>
    %8 = vector.shape_cast %7 : vector<1x8x4xf32> to vector<8x4xf32>
    %cst_8 = arith.constant dense<0.000000e+00> : vector<8x128xf32>
    %9 = tpu.matmul %8, %6, %cst_8 {dimension_numbers = #tpu.dot_dimension_numbers<[1], [0], [0], [1], [0, 0, 1, 1], [], []>, precision = #tpu.contract_precision<fp32>} : vector<8x4xf32>, vector<4x128xf32>, vector<8x128xf32> -> vector<8x128xf32>
    %10 = arith.addf %5, %9 : vector<8x128xf32>
    %11 = vector.extract_strided_slice %4 {offsets = [0, 1], sizes = [4, 128], strides = [1, 1]} : vector<4x256xf32> to vector<4x128xf32>
    %c1 = arith.constant 1 : index
    %c0_9 = arith.constant 0 : index
    %c0_10 = arith.constant 0 : index
    %12 = vector.load %arg4[%c1, %c0_9, %c0_10] : memref<3x8x4xf32, #tpu.memory_space<vmem>>, vector<1x8x4xf32>
    %13 = vector.shape_cast %12 : vector<1x8x4xf32> to vector<8x4xf32>
    %cst_11 = arith.constant dense<0.000000e+00> : vector<8x128xf32>
    %14 = tpu.matmul %13, %11, %cst_11 {dimension_numbers = #tpu.dot_dimension_numbers<[1], [0], [0], [1], [0, 0, 1, 1], [], []>, precision = #tpu.contract_precision<fp32>} : vector<8x4xf32>, vector<4x128xf32>, vector<8x128xf32> -> vector<8x128xf32>
    %15 = arith.addf %10, %14 : vector<8x128xf32>
    %16 = vector.extract_strided_slice %4 {offsets = [0, 2], sizes = [4, 128], strides = [1, 1]} : vector<4x256xf32> to vector<4x128xf32>
    %c2 = arith.constant 2 : index
    %c0_12 = arith.constant 0 : index
    %c0_13 = arith.constant 0 : index
    %17 = vector.load %arg4[%c2, %c0_12, %c0_13] : memref<3x8x4xf32, #tpu.memory_space<vmem>>, vector<1x8x4xf32>
    %18 = vector.shape_cast %17 : vector<1x8x4xf32> to vector<8x4xf32>
    %cst_14 = arith.constant dense<0.000000e+00> : vector<8x128xf32>
    %19 = tpu.matmul %18, %16, %cst_14 {dimension_numbers = #tpu.dot_dimension_numbers<[1], [0], [0], [1], [0, 0, 1, 1], [], []>, precision = #tpu.contract_precision<fp32>} : vector<8x4xf32>, vector<4x128xf32>, vector<8x128xf32> -> vector<8x128xf32>
    %20 = arith.addf %15, %19 : vector<8x128xf32>
    %c0_15 = arith.constant 0 : index
    %c0_16 = arith.constant 0 : index
    %21 = vector.load %arg5[%c0_15, %c0_16] : memref<8x1xf32, #tpu.memory_space<vmem>>, vector<8x1xf32>
    %22 = vector.broadcast %21 : vector<8x1xf32> to vector<8x128xf32>
    %23 = arith.addf %20, %22 : vector<8x128xf32>
    %cst_17 = arith.constant 0.000000e+00 : f32
    %24 = vector.broadcast %cst_17 : f32 to vector<8x128xf32>
    %25 = arith.maximumf %23, %24 : vector<8x128xf32>
    %c0_18 = arith.constant 0 : index
    %c0_19 = arith.constant 0 : index
    %c0_20 = arith.constant 0 : index
    %26 = vector.load %arg6[%c0_18, %c0_19, %c0_20] : memref<1x8x128xf32, #tpu.memory_space<vmem>>, vector<1x8x128xf32>
    %27 = vector.shape_cast %26 : vector<1x8x128xf32> to vector<8x128xf32>
    %28 = vector.shape_cast %25 : vector<8x128xf32> to vector<1x8x128xf32>
    tpu.vector_store %arg6[%c0_18, %c0_19, %c0_20], %28 {strides = array<i32>} : memref<1x8x128xf32, #tpu.memory_space<vmem>>, vector<1x8x128xf32>,
    return
  }
  func.func @transform_0(%arg0: i32, %arg1: i32) -> (i32, i32, i32) {
    %c0_i32 = arith.constant 0 : i32
    %c0_i32_0 = arith.constant 0 : i32
    return %arg0, %c0_i32, %arg1 : i32, i32, i32
  }
  func.func @transform_1(%arg0: i32, %arg1: i32) -> (i32, i32, i32) {
    %c1_i32 = arith.constant 1 : i32
    %0 = arith.addi %arg1, %c1_i32 : i32
    %c1_i32_0 = arith.constant 1 : i32
    %1 = arith.muli %0, %c1_i32_0 : i32
    %c0_i32 = arith.constant 0 : i32
    %c0_i32_1 = arith.constant 0 : i32
    return %arg0, %c0_i32, %1 : i32, i32, i32
  }
  func.func @transform_2(%arg0: i32, %arg1: i32) -> (i32, i32, i32) {
    %c0_i32 = arith.constant 0 : i32
    %c0_i32_0 = arith.constant 0 : i32
    %c0_i32_1 = arith.constant 0 : i32
    %c0_i32_2 = arith.constant 0 : i32
    return %c0_i32, %c0_i32_0, %c0_i32_1 : i32, i32, i32
  }
  func.func @transform_3(%arg0: i32, %arg1: i32) -> (i32, i32) {
    %c0_i32 = arith.constant 0 : i32
    %c0_i32_0 = arith.constant 0 : i32
    %c0_i32_1 = arith.constant 0 : i32
    return %c0_i32, %c0_i32_0 : i32, i32
  }
  func.func @transform_4(%arg0: i32, %arg1: i32) -> (i32, i32, i32) {
    %c0_i32 = arith.constant 0 : i32
    %c0_i32_0 = arith.constant 0 : i32
    return %arg0, %c0_i32, %arg1 : i32, i32, i32
  }
}

</mosaic_0001>

<bundles_post_ra>
// kernel: basic_conv1d.1
= control target key start
LH: loop header
LB: loop body
LE: loop exit
PB: predicated region body
PF: predicated region fallthrough
CT: control target
= control target key end

     0   :  { %9 = vsyncpa [#allocation3], 0  ;;  %s2271_s0 = inlined_call_operand.vmem [shape: f32[2,4,256], index: 0, kind: input, shape index: {}, may-alias: {0,1}]   ;;  %s2272_s1 = inlined_call_operand.vmem [shape: f32[2,4,256], index: 1, kind: input, shape index: {}, may-alias: {0,1}]   ;;  %s2273_s2 = inlined_call_operand.vmem [shape: f32[3,8,4], index: 2, kind: input, shape index: {}]   ;;  %s2274_s3 = inlined_call_operand.vmem [shape: f32[8,1], index: 3, kind: input, shape index: {}]   ;;  %s2275_s4 = inlined_call_operand.hbm [shape: f32[2,8,128], index: 4, kind: output, shape index: {}]  }
   0x1   :  { %11 = vsyncpa [#allocation3 + $0x1], 0  ;;  %s2068_s15 = smov 0   ;;  %s2070_s16 = smov 0  }
   0x2   :  { %s2072_s17 = smov 0   ;;  %s2074_s18 = smov 0  }
   0x3   :  { %s2076_s19 = smov 0   ;;  %s2078_s20 = smov 0  }
   0x4 LB: > { %s1752_s21 = sadd.s32 4294967295, %s2035_s20   ;;  %s1753_s22 = sadd.s32 4294967294, %s2035_s20   ;;  %s2035_s20 = sphi %s2078_s20, %s17_s20   ;;  %s2031_s19 = sphi %s2076_s19, %s2282_s19   ;;  %s2027_s18 = sphi %s2074_s18, %s2281_s18   ;;  %s2023_s17 = sphi %s2072_s17, %s2280_s17   ;;  %s2019_s16 = sphi %s2070_s16, %s2279_s16   ;;  %s2015_s15 = sphi %s2068_s15, %s2278_s15  }
   0x5   : > { %s29_s23 = sadd.s32 1, %s2031_s19  ;;  %s138_s24 = sadd.s32 1, %s2023_s17 }
   0x6   : > { %p31_p0 = scmp.ge.s32.totalorder %s29_s23, 2  ;;  %p148_p1 = scmp.ne.s32.totalorder %s2023_s17, %s2019_s16 }
   0x7   : > { %p149_p2 = scmp.eq.s32.totalorder %s1752_s21, 1  ;;  %p154_p3 = scmp.ne.s32.totalorder %s2019_s16, %s2015_s15 }
   0x8   : > { %s2284_s23 = smov (%p31_p0, %s29_s23), 0  ;;  %p155_p5 = scmp.eq.s32.totalorder %s1753_s22, 1 }
   0x9   : > { %p2108_p4 = por %p149_p2, %p148_p1  ;;  %s133_s26 = ssub.s32 %s2031_s19, %s2284_s23 }
   0xa   : > { %p1756_p6 = scmp.ge.s32.totalorder %s2035_s20, 1  ;;  %p136_p7 = scmp.eq.s32.totalorder %s133_s26, 0 }
   0xb   : > { %p2115_p8 = por %p155_p5, %p154_p3  ;;  %p203_p9 = scmp.lt.s32.totalorder %s2035_s20, 3 }
   0xc   : > { %s2121_s28 = scalar_select %p136_p7, %s2023_s17, %s138_s24  }
   0xd   : > { %p204_p10 = pnand %p1756_p6, %p203_p9 }
   0xe   : > { %p241_p11 = scmp.lt.s32.totalorder (!%p204_p10), %s2027_s18, 1  ;;  %s2039_s12 = smov (!%p204_p10), 127  }
   0xf   : > { %207 = sbr.rel (%p204_p10) target bundleno = 403 (0x193), region = 36  ;;  %s2040_s13 = smov (!%p204_p10), 126  }
  0x10   : > { %s238_s6 = sand.u32 (!%p204_p10), 1, %s2019_s16   ;;  %s2042_s22 = smov (!%p204_p10), [#allocation2]  }
  0x11   : > { %s1646_s14 = scalar_lea.sflag (!%p204_p10), [#allocation3], %s238_s6  ;;  %s1963_s24 = sshll.u32 (!%p204_p10), %s2042_s22, 4  ;;  %s1964_s24 = int_to_ptr.vmem [resolvable:$false] %s1963_s24 }
  0x14   : > { %v2037_v0 = vmov 0.0   ;;  %s242_s29 = scalar_select %p241_p11, %s2027_s18, 1  ;;  %vm2038_vm0 = vmmov 0   ;;  %v1636_v3 = vld [vmem:[%s2274_s3] sm:$0xff]  ;;  %v2041_v4 = vmov 0   ;;  %v1762_v5 = vld [vmem:[%s2273_s2 + $0x8] sm:$0xff] }
  0x15   : > { %1808 = vmatprep.subr.mxu0 %v2037_v0  ;;  %1813 = vmatprep.subr.mxu1 %v2037_v0  ;;  %vm272_vm1 = vcmask 31744   ;;  %v261_v9 = vld [vmem:[%s2273_s2] sm:$0xff]  ;;  %vm276_vm2 = vcmask 1043456   ;;  %vm270_vm3 = vcmask 1039360   ;;  %v1763_v25 = vld [vmem:[%s2273_s2 + $0x10] sm:$0xff]  ;;  %vm1182_vm4 = vcmask 1031168  }
  0x16   : > { %1810 = vmatprep.mubr.msk.f32.mxu0 %vm2038_vm0, %v2037_v0  ;;  %1815 = vmatprep.mubr.msk.f32.mxu1 %vm2038_vm0, %v2037_v0  ;;  %s1768_s30 = sshll.u32 %s242_s29, 3  ;;  %v274_v6 = vsel %vm272_vm1, %v1762_v5, 0  ;;  %v726_v12 = vsel %vm272_vm1, %v261_v9, 0  ;;  %v1185_v30 = vsel %vm272_vm1, %v1763_v25, 0 }
  0x17   : > { %s248_s7 = scalar_lea.vmem %s2271_s0, %s1768_s30  ;;  %s1770_s8 = sadd.s32 4, %s1768_s30  ;;  %1958 = vset.pattern.permute.xlu0 %v2041_v4  ;;  %v2144_v7 = vand.u32 4294901760, %v274_v6  ;;  %v2152_v15 = vand.u32 4294901760, %v726_v12  ;;  %v2173_v36 = vand.u32 4294901760, %v1185_v30 }
  0x18   : > { %v259_v1 = vld [vmem:[%s248_s7] sm:$0xf]  ;;  %s257_s11 = scalar_lea.vmem %s2272_s1, %s1770_s8  ;;  %s1757_s7 = sshll.u32 %s238_s6, 3 }
  0x19   : > { %266 = vrot.lane.b32.xlu0 %v259_v1, %s2039_s12  ;;  %1178 = vrot.lane.b32.xlu1 %v259_v1, %s2040_s13  ;;  %v260_v2 = vld [vmem:[%s257_s11] sm:$0xf]  ;;  %v346_v8 = vsub.f32 %v274_v6, %v2144_v7  ;;  %v728_v14 = vsel %vm276_vm2, %v259_v1, 0  ;;  %v2158_v23 = vsub.f32 %v726_v12, %v2152_v15  ;;  %v1256_v40 = vsub.f32 %v1185_v30, %v2173_v36  ;;  %s1765_s8 = sshll.u32 %s2027_s18, 7  ;;  %s240_s9 = scalar_lea.vmem [#allocation2], %s1757_s7 }
  0x1a   : > { %v2154_v18 = vand.u32 4294901760, %v728_v14  ;;  %s1660_s10 = sshll.u32 %s240_s9, 4  ;;  %s1965_s18 = scalar_lea.vmem %s1964_s24, 256  ;;  %s1661_s10 = int_to_ptr.vmem [resolvable:$true] %s1660_s10 }
  0x1b   : > { %v347_v10 = vand.u32 4294901760, %v346_v8  ;;  %v798_v28 = vand.u32 4294901760, %v2158_v23  ;;  %v1257_v43 = vand.u32 4294901760, %v1256_v40  ;;  %s1959_s21 = scalar_lea.vmem %s1661_s10, 128  ;;  %p1966_p1 = scmp.lt.s32.totalorder %s1661_s10, %s1964_s24 }
  0x1c   : > { %v838_v26 = vsub.f32 %v728_v14, %v2154_v18  ;;  %p1960_p12 = scmp.ne.s32.totalorder %s1661_s10, %s1959_s21  ;;  %p1967_p2 = scmp.lt.s32.totalorder %s1965_s18, %s1959_s21 }
  0x1d   : > { %268 = vrot.lane.b32.xlu0 %v260_v2, %s2039_s12  ;;  %1180 = vrot.lane.b32.xlu1 %v260_v2, %s2040_s13  ;;  %v348_v13 = vsub.f32 %v346_v8, %v347_v10  ;;  %v799_v35 = vsub.f32 %v2158_v23, %v798_v28  ;;  %v1258_v45 = vsub.f32 %v1256_v40, %v1257_v43  ;;  %s1658_s13 = scalar_lea.hbm %s2275_s4, %s1765_s8 }
  0x1e   : > { %v839_v32 = vand.u32 4294901760, %v838_v26  ;;  %p1961_p13 = pnand %p1960_p12, %p2108_p4  ;;  %p1968_p3 = por %p1967_p2, %p1966_p1 }
  0x1f   : > { %v349_v20 = vand.u32 4294901760, %v348_v13  ;;  %v800_v38 = vand.u32 4294901760, %v799_v35  ;;  %v1259_v47 = vand.u32 4294901760, %v1258_v45 }
  0x20   : > { %v840_v39 = vsub.f32 %v838_v26, %v839_v32  ;;  %p1962_p0 = pneg %p1961_p13 }
  0x21   : > { %1639 = vperm.xlu0 %1958, %v1636_v3  }
  0x22   : > { %v841_v42 = vand.u32 4294901760, %v840_v39  ;;  %p1969_p5 = pnand %p1968_p3, %p1962_p0 }
  0x8b   : > { %v267_v11 = vpop.permute.xlu0 %266  ;;  %v1179_v21 = vpop.permute.xlu1 %1178 }
  0x8f   : > { %v269_v16 = vpop.permute.xlu0 %268  ;;  %v1181_v29 = vpop.permute.xlu1 %1180 }
  0x90   : > { %v271_v17 = vsel %vm270_vm3, %v267_v11, %v269_v16  ;;  %v1183_v34 = vsel %vm1182_vm4, %v1179_v21, %v1181_v29 }
  0x91   : > { %v277_v19 = vsel %vm276_vm2, %v271_v17, 0  ;;  %v1187_v37 = vsel %vm276_vm2, %v1183_v34, 0 }
  0x92   : > { %v310_v22 = vand.u32 4294901760, %v277_v19  ;;  %v1220_v41 = vand.u32 4294901760, %v1187_v37 }
  0x94   : > { %v387_v24 = vsub.f32 %v277_v19, %v310_v22  ;;  %1809 = vmatpush3.msra.mxu0 %v310_v22  ;;  %v1297_v44 = vsub.f32 %v1187_v37, %v1220_v41 }
  0x95   : > { %1811 = vmatmul.mubr.f32.vlgmr.msra.gmra.mxu0 %v349_v20  ;;  %1818 = vmatprep.subr.mxu0 %v2037_v0 }
  0x96   : > { %1819 = vmatpush3.msra.mxu0 %v387_v24  ;;  %1820 = vmatprep.mubr.msk.f32.mxu0 %vm2038_vm0, %v2037_v0  ;;  %v388_v27 = vand.u32 4294901760, %v387_v24  ;;  %v1298_v46 = vand.u32 4294901760, %v1297_v44 }
  0x97   : > { %1828 = vmatprep.subr.mxu0 %v2037_v0 }
  0x98   : > { %v389_v31 = vsub.f32 %v387_v24, %v388_v27  ;;  %v1299_v48 = vsub.f32 %v1297_v44, %v1298_v46 }
  0x99   : > { %1821 = vmatmul.mubr.f32.vlgmr.msra.gmra.mxu0 %v346_v8 }
  0x9a   : > { %1829 = vmatpush3.msra.mxu0 %v388_v27  ;;  %v390_v33 = vand.u32 4294901760, %v389_v31  ;;  %1830 = vmatprep.mubr.msk.f32.mxu0 %vm2038_vm0, %v2037_v0  ;;  %v1300_v49 = vand.u32 4294901760, %v1299_v48 }
  0x9b   : > { %1838 = vmatprep.subr.mxu0 %v2037_v0 }
  0x9c   : > { %1814 = vmatpush3.msra.mxu1 %v390_v33 }
  0x9d   : > { %1816 = vmatmul.mubr.f32.vlgmr.msra.gmra.mxu1 %v2144_v7  ;;  %1823 = vmatprep.subr.mxu1 %v2037_v0 }
  0x9e   : > { %1831 = vmatmul.mubr.f32.vlgmr.msra.gmra.mxu0 %v2144_v7  ;;  %1824 = vmatpush3.msra.mxu1 %v310_v22 }
  0x9f   : > { %1825 = vmatprep.mubr.msk.f32.mxu1 %vm2038_vm0, %v2037_v0  ;;  %1833 = vmatprep.subr.mxu1 %v2037_v0 }
  0xa0   : > { %1839 = vmatpush3.msra.mxu0 %v2154_v18  ;;  %1840 = vmatprep.mubr.msk.f32.mxu0 %vm2038_vm0, %v2037_v0 }
  0xa1   : > { %1826 = vmatmul.mubr.f32.vlgmr.msra.gmra.mxu1 %v347_v10  ;;  %1848 = vmatprep.subr.mxu0 %v2037_v0 }
  0xa2   : > { %1834 = vmatpush3.msra.mxu1 %v310_v22  ;;  %1841 = vmatmul.mubr.f32.vlgmr.msra.gmra.mxu0 %v800_v38  ;;  %v1640_v38 = vpop.permute.xlu0 %1639 }
  0xa3   : > { %1835 = vmatprep.mubr.msk.f32.mxu1 %vm2038_vm0, %v2037_v0  ;;  %1849 = vmatpush3.msra.mxu0 %v838_v26 }
  0xa4   : > { %1850 = vmatprep.mubr.msk.f32.mxu0 %vm2038_vm0, %v2037_v0  ;;  %1843 = vmatprep.subr.mxu1 %v2037_v0 }
  0xa5   : > { %1836 = vmatmul.mubr.f32.vlgmr.msra.gmra.mxu1 %v2144_v7  ;;  %1858 = vmatprep.subr.mxu0 %v2037_v0 }
  0xa6   : > { %1851 = vmatmul.mubr.f32.vlgmr.msra.gmra.mxu0 %v2158_v23  ;;  %1844 = vmatpush3.msra.mxu1 %v841_v42 }
  0xa7   : > { %1859 = vmatpush3.msra.mxu0 %v839_v32  ;;  %1845 = vmatprep.mubr.msk.f32.mxu1 %vm2038_vm0, %v2037_v0 }
  0xa8   : > { %1860 = vmatprep.mubr.msk.f32.mxu0 %vm2038_vm0, %v2037_v0  ;;  %1868 = vmatprep.subr.mxu0 %v2037_v0 }
  0xa9   : > { %1846 = vmatmul.mubr.f32.vlgmr.msra.gmra.mxu1 %v2152_v15  ;;  %1853 = vmatprep.subr.mxu1 %v2037_v0 }
  0xaa   : > { %1861 = vmatmul.mubr.f32.vlgmr.msra.gmra.mxu0 %v2152_v15  ;;  %1854 = vmatpush3.msra.mxu1 %v2154_v18 }
  0xab   : > { %1869 = vmatpush3.msra.mxu0 %v1220_v41  ;;  %1855 = vmatprep.mubr.msk.f32.mxu1 %vm2038_vm0, %v2037_v0 }
  0xac   : > { %1870 = vmatprep.mubr.msk.f32.mxu0 %vm2038_vm0, %v2037_v0  ;;  %1878 = vmatprep.subr.mxu0 %v2037_v0 }
  0xad   : > { %1856 = vmatmul.mubr.f32.vlgmr.msra.gmra.mxu1 %v798_v28  ;;  %1863 = vmatprep.subr.mxu1 %v2037_v0 }
  0xae   : > { %1871 = vmatmul.mubr.f32.vlgmr.msra.gmra.mxu0 %v1259_v47  ;;  %1864 = vmatpush3.msra.mxu1 %v2154_v18 }
  0xaf   : > { %1879 = vmatpush3.msra.mxu0 %v1297_v44  ;;  %1865 = vmatprep.mubr.msk.f32.mxu1 %vm2038_vm0, %v2037_v0 }
  0xb0   : > { %1873 = vmatprep.subr.mxu1 %v2037_v0  ;;  %1880 = vmatprep.mubr.msk.f32.mxu0 %vm2038_vm0, %v2037_v0 }
  0xb1   : > { %1888 = vmatprep.subr.mxu0 %v2037_v0  ;;  %1866 = vmatmul.mubr.f32.vlgmr.msra.gmra.mxu1 %v2152_v15 }
  0xb2   : > { %1874 = vmatpush3.msra.mxu1 %v1300_v49  ;;  %1881 = vmatmul.mubr.f32.vlgmr.msra.gmra.mxu0 %v1256_v40 }
  0xb3   : > { %1889 = vmatpush3.msra.mxu0 %v1298_v46  ;;  %1875 = vmatprep.mubr.msk.f32.mxu1 %vm2038_vm0, %v2037_v0 }
  0xb4   : > { %1883 = vmatprep.subr.mxu1 %v2037_v0  ;;  %1890 = vmatprep.mubr.msk.f32.mxu0 %vm2038_vm0, %v2037_v0 }
  0xb5   : > { %1876 = vmatmul.mubr.f32.vlgmr.msra.gmra.mxu1 %v2173_v36 }
  0xb6   : > { %1884 = vmatpush3.msra.mxu1 %v1220_v41  ;;  %1885 = vmatprep.mubr.msk.f32.mxu1 %vm2038_vm0, %v2037_v0 }
  0xb7   : > { %1893 = vmatprep.subr.mxu1 %v2037_v0  ;;  %1891 = vmatmul.mubr.f32.vlgmr.msra.gmra.mxu0 %v2173_v36 }
  0xb9   : > { %1886 = vmatmul.mubr.f32.vlgmr.msra.gmra.mxu1 %v1257_v43 }
  0xba   : > { %1894 = vmatpush3.msra.mxu1 %v1220_v41  ;;  %1895 = vmatprep.mubr.msk.f32.mxu1 %vm2038_vm0, %v2037_v0 }
  0xbd   : > { %1896 = vmatmul.mubr.f32.vlgmr.msra.gmra.mxu1 %v2173_v36 }
 0x155   : > { %v351_v50 = vpop.f32.mrf.mxu0 }
 0x157   : > { %v1812_v51 = vpop.f32.mrf.mxu0 }
 0x159   : > { %v501_v52 = vpop.f32.mrf.mxu0 }
 0x15b   : > { %v1822_v53 = vpop.f32.mrf.mxu0 }
 0x15d   : > { %v427_v54 = vpop.f32.mrf.mxu1 }
 0x15e   : > { %v428_v55 = vadd.f32 %v427_v54, %v351_v50  ;;  %v649_v56 = vpop.f32.mrf.mxu0 }
 0x15f   : > { %v1817_v57 = vpop.f32.mrf.mxu1 }
 0x160   : > { %v502_v58 = vadd.f32 %v501_v52, %v428_v55  ;;  %v1832_v59 = vpop.f32.mrf.mxu0 }
 0x161   : > { %v575_v60 = vpop.f32.mrf.mxu1 }
 0x162   : > { %v576_v61 = vadd.f32 %v575_v60, %v502_v58  ;;  %v802_v62 = vpop.f32.mrf.mxu0 }
 0x163   : > { %v1827_v63 = vpop.f32.mrf.mxu1 }
 0x164   : > { %v650_v1 = vadd.f32 %v649_v56, %v576_v61  ;;  %v1842_v2 = vpop.f32.mrf.mxu0 }
 0x165   : > { %v721_v3 = vpop.f32.mrf.mxu1 }
 0x166   : > { %v722_v0 = vadd.f32 %v721_v3, %v650_v1  ;;  %v952_v4 = vpop.f32.mrf.mxu0 }
 0x167   : > { %v1837_v5 = vpop.f32.mrf.mxu1 }
 0x168   : > { %v1852_v6 = vpop.f32.mrf.mxu0  ;;  %v803_v8 = vadd.f32 %v802_v62, %v722_v0 }
 0x169   : > { %v878_v7 = vpop.f32.mrf.mxu1 }
 0x16a   : > { %v1100_v9 = vpop.f32.mrf.mxu0  ;;  %v879_v13 = vadd.f32 %v878_v7, %v803_v8 }
 0x16b   : > { %v1847_v10 = vpop.f32.mrf.mxu1 }
 0x16c   : > { %v1862_v11 = vpop.f32.mrf.mxu0  ;;  %v953_v18 = vadd.f32 %v952_v4, %v879_v13 }
 0x16d   : > { %v1026_v12 = vpop.f32.mrf.mxu1 }
 0x16e   : > { %v1261_v14 = vpop.f32.mrf.mxu0  ;;  %v1027_v23 = vadd.f32 %v1026_v12, %v953_v18 }
 0x16f   : > { %v1857_v15 = vpop.f32.mrf.mxu1 }
 0x170   : > { %v1872_v16 = vpop.f32.mrf.mxu0  ;;  %v1101_v30 = vadd.f32 %v1100_v9, %v1027_v23 }
 0x171   : > { %v1172_v17 = vpop.f32.mrf.mxu1 }
 0x172   : > { %v1411_v19 = vpop.f32.mrf.mxu0  ;;  %v1173_v35 = vadd.f32 %v1172_v17, %v1101_v30 }
 0x173   : > { %v1867_v20 = vpop.f32.mrf.mxu1 }
 0x174   : > { %v1882_v21 = vpop.f32.mrf.mxu0 }
 0x175   : > { %v1337_v22 = vpop.f32.mrf.mxu1 }
 0x176   : > { %v1338_v24 = vadd.f32 %v1337_v22, %v1261_v14 }
 0x177   : > { %v1877_v25 = vpop.f32.mrf.mxu1  ;;  %v1559_v26 = vpop.f32.mrf.mxu0 }
 0x178   : > { %v1412_v27 = vadd.f32 %v1411_v19, %v1338_v24 }
 0x179   : > { %v1485_v28 = vpop.f32.mrf.mxu1  ;;  %v1892_v29 = vpop.f32.mrf.mxu0 }
 0x17a   : > { %v1486_v31 = vadd.f32 %v1485_v28, %v1412_v27 }
 0x17b   : > { %v1887_v32 = vpop.f32.mrf.mxu1 }
 0x17c   : > { %v1560_v33 = vadd.f32 %v1559_v26, %v1486_v31 }
 0x17d   : > { %v1631_v34 = vpop.f32.mrf.mxu1 }
 0x17e   : > { %v1632_v36 = vadd.f32 %v1631_v34, %v1560_v33 }
 0x17f   : > { %v1897_v37 = vpop.f32.mrf.mxu1 }
 0x180   : > { %v1635_v39 = vadd.f32 %v1632_v36, %v1173_v35 }
 0x182   : > { %v1642_v40 = vadd.f32 %v1640_v38, %v1635_v39 }
 0x184   : > { %v1643_v41 = vmax.f32 %v1642_v40, 0.0 }
 0x186   : > { %1644 = vst [vmem:[%s240_s9] sm:$0xff] %v1643_v41 }
 0x187   : > { %1972 = shalt.err (!%p1969_p5)
}
 0x188   : > { %s1973_s26 = scalar_lea.hbm %s1658_s13, 128  ;;  %s1977_s5 = scalar_lea.hbm %s2275_s4, 256 }
 0x189   : > { %p1974_p6 = scmp.ne.s32.totalorder %s1658_s13, %s1973_s26  ;;  %p1978_p10 = scmp.lt.s32.totalorder %s1658_s13, %s2275_s4 }
 0x18a   : > { %p1979_p11 = scmp.lt.s32.totalorder %s1977_s5, %s1973_s26 }
 0x18b   : > { %p1975_p7 = pnand %p1974_p6, %p2108_p4 }
 0x18c   : > { %p1980_p12 = por %p1979_p11, %p1978_p10 }
 0x18d   : > { %p1976_p9 = pneg %p1975_p7 }
 0x18f   : > { %p1981_p13 = pnand %p1980_p12, %p1976_p9 }
 0x191   : > { %1984 = shalt.err (!%p1981_p13)
}
 0x192   : > { %1898 = dma.vmem_to_hbm [thread:$0]  (%p2108_p4), %s1661_s10, 128, %s1658_s13, %s1646_s14  }
 0x193 PF: > { %p1904_p0 = scmp.ge.s32.totalorder %s2035_s20, 2  ;;  %s1672_s8 = sand.u32 1, %s2015_s15  }
 0x194   : > { %s1673_s9 = scalar_lea.sflag [#allocation3], %s1672_s8 }
 0x195   : > { %p1901_p1 = pnand %p1904_p0, %p2115_p8 }
 0x197   : > { %p1902_p2 = pneg %p1901_p1 }
 0x199   : > { %2010 = dma.done.wait (%p1902_p2), %s1673_s9, 128  }
 0x19a   : > { %2012 = vsyncadd (%p1902_p2), %s1673_s9, 4294967168  ;;  %s17_s20 = sadd.s32 1, %s2035_s20   ;;  %s2278_s15 = smov %s2019_s16 }
 0x19b   : > { %p14_p3 = scmp.ge.s32.totalorder %s17_s20, 4   ;;  %s2279_s16 = smov %s2023_s17 }
 0x19c   : > { %s2280_s17 = smov %s2121_s28  ;;  %s2281_s18 = smov %s2031_s19 }
 0x19d   : > { %s2282_s19 = smov %s2284_s23  ;;  %16 = sbr.rel (!%p14_p3) target bundleno = 4 (0x4), region = 76 }
 0x1a2   :  { %1678 = vsyncpa [#allocation3], 1 }
 0x1a3   :  { %1680 = vsyncpa [#allocation3 + $0x1], 1 }

</bundles_post_ra>
